<compile_context>
chip_gen: v6e
topology: v6e:2x2x1
jax: 0.10.0
libtpu: 0.0.40
codegen_flags: <defaults>
</compile_context>

<pallas_src>
import numpy as np
import jax
import jax.numpy as jnp
from jax.experimental import pallas as pl
from jax.experimental.pallas import tpu as pltpu


def _round_up(x, m):
    return (x + m - 1) // m * m


# --------------------------------------------------------------------------
# Encoder kernel: one tap-stacked bf16 conv matmul + masked-pool matmul + FC
# Grid step i handles one (half, batch-element) chunk of V view images.
# --------------------------------------------------------------------------
def _make_encoder_kernel(inv_hw):
    def kernel(x_ref, wconv_ref, bconv_ref, wfc_ref, bfc_ref, pool_ref, o_ref):
        x = x_ref[...]                                  # (9C, V*rp) bf16, tap-stacked
        # 3x3 conv == one K=9C bf16 matmul (host pre-shifted the taps).
        conv = jnp.dot(wconv_ref[...], x,
                       preferred_element_type=jnp.float32)        # (Cmid, V*rp) f32
        conv = jnp.maximum(conv + bconv_ref[...], 0.0)             # bias (Cmid,1) + ReLU
        conv_b = conv.astype(jnp.bfloat16)

        # Masked global-average pool as one bf16 MXU matmul (contract lanes).
        # pool_ref is an exact 0/1 mask; apply 1/(H*W) on the tiny f32 result.
        pooled = jax.lax.dot_general(
            conv_b, pool_ref[...], (((1,), (1,)), ((), ())),
            preferred_element_type=jnp.float32)                    # (Cmid, V) f32
        pooled = (pooled * inv_hw).astype(jnp.bfloat16)

        # FC: y = pooled.T @ wfc + bfc   (lane-padded to Lp for dense stores)
        y = jax.lax.dot_general(
            pooled, wfc_ref[...], (((0,), (0,)), ((), ())),
            preferred_element_type=jnp.float32)                    # (V, Lp) f32
        o_ref[0] = y + bfc_ref[...]                                # bfc (1, Lp)

    return kernel


# --------------------------------------------------------------------------
# Epilogue micro-kernel: diff + BatchNorm1d(V) with train-mode batch stats
# --------------------------------------------------------------------------
def _make_bn_kernel(inv_cnt):
    def kernel(c_ref, f_ref, gamma_ref, beta_ref, mask_ref, te_ref):
        diff = c_ref[...] - f_ref[...]          # (bs, V, Lp) f32
        mask = mask_ref[...]                    # (1, 1, Lp) — zero out lane padding
        dm = diff * mask
        s = jnp.sum(jnp.sum(dm, axis=2, keepdims=True), axis=0, keepdims=True)
        mean = s * inv_cnt                      # (1, V, 1)
        cen = (diff - mean) * mask
        sq = jnp.sum(jnp.sum(cen * cen, axis=2, keepdims=True), axis=0, keepdims=True)
        var = sq * inv_cnt                      # biased variance (train-mode BN)
        te = (diff - mean) * jax.lax.rsqrt(var + 1e-5) * gamma_ref[...] + beta_ref[...]
        te_ref[...] = te.astype(te_ref.dtype)

    return kernel


# --------------------------------------------------------------------------
# Forward wrapper (layout-only host prep + two pallas_calls)
# --------------------------------------------------------------------------
@jax.jit
def gtask_forward(curr_obs, final_obs, params):
    bs, V, C, H, W = curr_obs.shape
    c_mid = params["conv_w"].shape[0]
    L = params["fc_w"].shape[0]
    Lp = _round_up(L, 128)           # lane-dense latent width for kernel outputs

    Hp, Wp = H + 2, W + 2
    mh = bs * V                      # images per half
    m2 = 2 * mh                      # curr + final stacked
    n_steps = 2 * bs                 # one grid step per (half, batch-element)
    rp = _round_up(Hp * Wp, 128)     # padded flattened-spatial columns per image
    s_max = 2 * Wp + 2               # largest tap shift
    ncol = V * rp                    # lane columns per grid step

    # ---- layout-only host prep: tap-stacked (9C, m2*rp) bf16 slab ----------
    x = jnp.concatenate([curr_obs, final_obs], axis=0).reshape(m2, C, H, W)
    x = jnp.pad(x, ((0, 0), (0, 0), (1, 1), (1, 1)))               # conv zero pad=1
    xf = x.reshape(m2, C, Hp * Wp)
    xf = jnp.pad(xf, ((0, 0), (0, 0), (0, rp + s_max - Hp * Wp)))  # tail pad per image
    taps = jnp.stack([xf[:, :, (dy * Wp + dx):(dy * Wp + dx) + rp]
                      for dy in range(3) for dx in range(3)], axis=1)   # (m2, 9, C, rp)
    slab = jnp.transpose(taps.reshape(m2, 9 * C, rp), (1, 0, 2))
    slab = slab.reshape(9 * C, m2 * rp).astype(jnp.bfloat16)

    # ---- parameters in kernel layout ----------------------------------------
    # conv_w (torch OIHW) -> (Cmid, 9*C) with column index (dy*3+dx)*C + c
    wconv = params["conv_w"].transpose(0, 2, 3, 1).reshape(c_mid, 9 * C).astype(jnp.bfloat16)
    bconv = params["conv_b"].reshape(c_mid, 1).astype(jnp.float32)
    wfc = jnp.pad(params["fc_w"].T, ((0, 0), (0, Lp - L))).astype(jnp.bfloat16)   # (Cmid, Lp)
    bfc = jnp.pad(params["fc_b"].reshape(1, L), ((0, 0), (0, Lp - L))).astype(jnp.float32)
    gamma = params["bn_gamma"].reshape(1, V, 1).astype(jnp.float32)
    beta = params["bn_beta"].reshape(1, V, 1).astype(jnp.float32)

    # ---- trace-time constants (numpy) ---------------------------------------
    # exact 0/1 pooling mask, block-diagonal per view image within a chunk:
    # pool[t, t*rp + h*Wp + w] = 1 for valid (h, w).  Size O(V^2 * rp), fixed.
    pool_np = np.zeros((V, ncol), np.float32)
    for t in range(V):
        for h in range(H):
            base = t * rp + h * Wp
            pool_np[t, base:base + W] = 1.0
    pool_mat = jnp.asarray(pool_np, dtype=jnp.bfloat16)
    lane_mask = jnp.asarray((np.arange(Lp) < L).astype(np.float32).reshape(1, 1, Lp))

    # ---- encoder pallas_call (parallel over halves x batch elements) --------
    enc_kernel = _make_encoder_kernel(inv_hw=1.0 / float(H * W))
    flops = int(2 * c_mid * 9 * C * m2 * rp            # conv matmuls
                + 2 * c_mid * V * ncol * n_steps       # pooling matmuls
                + 2 * V * c_mid * Lp * n_steps)        # FC matmuls
    bytes_acc = int(9 * C * m2 * rp * 2                # bf16 tap slab
                    + V * ncol * 2                     # pool mask
                    + c_mid * 9 * C * 2 + c_mid * 4 + c_mid * Lp * 2 + Lp * 4
                    + n_steps * V * Lp * 4)            # encoder output

    # VMEM per step: slab block ~138 KB (x2 buffers), pool mask ~19 KB,
    # conv intermediate ~61 KB f32 — far under every generation's scoped limit.
    y_enc = pl.pallas_call(
        enc_kernel,
        out_shape=jax.ShapeDtypeStruct((n_steps, V, Lp), jnp.float32),
        grid=(n_steps,),
        in_specs=[
            pl.BlockSpec((9 * C, ncol), lambda i: (0, i)),     # tap-stacked obs slab
            pl.BlockSpec((c_mid, 9 * C), lambda i: (0, 0)),    # conv weights (resident)
            pl.BlockSpec((c_mid, 1), lambda i: (0, 0)),
            pl.BlockSpec((c_mid, Lp), lambda i: (0, 0)),
            pl.BlockSpec((1, Lp), lambda i: (0, 0)),
            pl.BlockSpec((V, ncol), lambda i: (0, 0)),         # pooling mask (resident)
        ],
        out_specs=pl.BlockSpec((1, V, Lp), lambda i: (i, 0, 0)),
        compiler_params=pltpu.CompilerParams(
            dimension_semantics=("parallel",)),                # megacore-shardable (v7x)
        cost_estimate=pl.CostEstimate(flops=flops, transcendentals=0,
                                      bytes_accessed=bytes_acc),
    )(slab, wconv, bconv, wfc, bfc, pool_mat)

    # ---- hoisted BN epilogue (tiny second pallas_call, whole arrays) --------
    curr_enc = y_enc[:bs]            # (bs, V, Lp)
    fin_enc = y_enc[bs:]             # (bs, V, Lp)
    bn_kernel = _make_bn_kernel(inv_cnt=1.0 / float(bs * L))
    te = pl.pallas_call(
        bn_kernel,
        out_shape=jax.ShapeDtypeStruct((bs, V, Lp), jnp.float32),
    )(curr_enc, fin_enc, gamma, beta, lane_mask)

    te_flat = te[..., :L].reshape(bs, V * L)
    fx_flat = fin_enc[..., :L].reshape(bs, V * L)
    return 0, te_flat, te_flat, fx_flat


# --------------------------------------------------------------------------
# Pure-JAX reference (for a loose correctness check; kernel feeds bf16 MXU)
# --------------------------------------------------------------------------
def _reference_forward(curr_obs, final_obs, params):
    def encode(obs):
        bs, V, C, H, W = obs.shape
        xx = obs.reshape(bs * V, C, H, W).astype(jnp.float32)
        y = jax.lax.conv_general_dilated(
            xx, params["conv_w"].astype(jnp.float32), window_strides=(1, 1),
            padding="SAME", dimension_numbers=("NCHW", "OIHW", "NCHW"))
        y = y + params["conv_b"][None, :, None, None]
        y = jnp.maximum(y, 0.0)
        pooled = jnp.mean(y, axis=(2, 3))
        z = pooled @ params["fc_w"].T + params["fc_b"][None, :]
        return z.reshape(bs, V, -1)

    curr_x = encode(curr_obs)
    final_x = encode(final_obs)
    diff = curr_x - final_x
    mean = jnp.mean(diff, axis=(0, 2), keepdims=True)
    var = jnp.mean((diff - mean) ** 2, axis=(0, 2), keepdims=True)
    normed = (diff - mean) * jax.lax.rsqrt(var + 1e-5)
    te = normed * params["bn_gamma"][None, :, None] + params["bn_beta"][None, :, None]
    bs = curr_obs.shape[0]
    return te.reshape(bs, -1), final_x.reshape(bs, -1)


def init_params(key, c_in=4, c_mid=8, latent_dim=32, num_views=5):
    k1, k2, k3 = jax.random.split(key, 3)
    return {
        # torch-style layouts; converted to kernel layouts inside the wrapper
        "conv_w": jax.random.normal(k1, (c_mid, c_in, 3, 3), jnp.float32) * 0.1,
        "conv_b": jnp.zeros((c_mid,), jnp.float32),
        "fc_w": jax.random.normal(k2, (latent_dim, c_mid), jnp.float32) * 0.1,
        "fc_b": jax.random.normal(k3, (latent_dim,), jnp.float32) * 0.01,
        # BatchNorm1d(5) affine params (torch init: gamma=1, beta=0)
        "bn_gamma": jnp.ones((num_views,), jnp.float32),
        "bn_beta": jnp.zeros((num_views,), jnp.float32),
    }


if __name__ == "__main__":
    bs, V, C, H, W = 2, 5, 4, 16, 16
    latent_dim = 32

    key = jax.random.PRNGKey(0)
    kp, kc, kf = jax.random.split(key, 3)
    params = init_params(kp, c_in=C, c_mid=8, latent_dim=latent_dim, num_views=V)

    curr_obs = jax.random.normal(kc, (bs, V, C, H, W), jnp.float32)
    final_obs = jax.random.normal(kf, (bs, V, C, H, W), jnp.float32)

    zero, task_embed, task_embed2, final_flat = gtask_forward(curr_obs, final_obs, params)
    jax.block_until_ready(task_embed)
    jax.block_until_ready(final_flat)

    assert int(zero) == 0
    assert task_embed.shape == (bs, V * latent_dim)
    assert final_flat.shape == (bs, V * latent_dim)
    assert bool(jnp.all(jnp.isfinite(task_embed)))
    assert bool(jnp.all(jnp.isfinite(final_flat)))

    # Loose numerical check vs pure-JAX f32 reference.  The kernel feeds bf16
    # operands to the MXU (inputs, conv weights, pooled acts, fc weights); BN's
    # rsqrt(var) amplifies that ~1e-2 relative error, hence the looser te atol
    # (flagged in the review as an accepted train-mode-BN numerics trade-off).
    te_ref, fx_ref = _reference_forward(curr_obs, final_obs, params)
    np.testing.assert_allclose(np.asarray(task_embed), np.asarray(te_ref),
                               rtol=1e-1, atol=1.5e-1)
    np.testing.assert_allclose(np.asarray(final_flat), np.asarray(fx_ref),
                               rtol=1e-1, atol=2e-2)

    print("KERNEL_OK")
</pallas_src>

<mosaic_0001>
module attributes {stable_mosaic.version = 11 : i64} {
  func.func @kernel(%arg0: memref<2x5x128xf32, #tpu.memory_space<vmem>>, %arg1: memref<2x5x128xf32, #tpu.memory_space<vmem>>, %arg2: memref<1x5x1xf32, #tpu.memory_space<vmem>>, %arg3: memref<1x5x1xf32, #tpu.memory_space<vmem>>, %arg4: memref<1x1x128xf32, #tpu.memory_space<vmem>>, %arg5: memref<2x5x128xf32, #tpu.memory_space<vmem>>) attributes {dimension_semantics = [], scalar_prefetch = 0 : i64, scratch_operands = 0 : i64, tpu.core_type = #tpu.core_type<tc>} {
    %c0 = arith.constant 0 : index
    %c0_0 = arith.constant 0 : index
    %c0_1 = arith.constant 0 : index
    %0 = vector.load %arg0[%c0, %c0_0, %c0_1] : memref<2x5x128xf32, #tpu.memory_space<vmem>>, vector<2x5x128xf32>
    %c0_2 = arith.constant 0 : index
    %c0_3 = arith.constant 0 : index
    %c0_4 = arith.constant 0 : index
    %1 = vector.load %arg1[%c0_2, %c0_3, %c0_4] : memref<2x5x128xf32, #tpu.memory_space<vmem>>, vector<2x5x128xf32>
    %2 = arith.subf %0, %1 : vector<2x5x128xf32>
    %c0_5 = arith.constant 0 : index
    %c0_6 = arith.constant 0 : index
    %c0_7 = arith.constant 0 : index
    %3 = vector.load %arg4[%c0_5, %c0_6, %c0_7] : memref<1x1x128xf32, #tpu.memory_space<vmem>>, vector<1x1x128xf32>
    %4 = vector.broadcast %3 : vector<1x1x128xf32> to vector<2x5x128xf32>
    %5 = arith.mulf %2, %4 : vector<2x5x128xf32>
    %cst = arith.constant dense<0.000000e+00> : vector<2x5xf32>
    %6 = vector.multi_reduction <add>, %5, %cst [2] : vector<2x5x128xf32> to vector<2x5xf32>
    %7 = vector.shape_cast %6 : vector<2x5xf32> to vector<2x5x1xf32>
    %cst_8 = arith.constant dense<0.000000e+00> : vector<5x1xf32>
    %8 = vector.multi_reduction <add>, %7, %cst_8 [0] : vector<2x5x1xf32> to vector<5x1xf32>
    %9 = vector.shape_cast %8 : vector<5x1xf32> to vector<1x5x1xf32>
    %cst_9 = arith.constant 1.562500e-02 : f32
    %10 = vector.broadcast %cst_9 : f32 to vector<1x5x1xf32>
    %11 = arith.mulf %9, %10 : vector<1x5x1xf32>
    %12 = vector.broadcast %11 : vector<1x5x1xf32> to vector<2x5x128xf32>
    %13 = arith.subf %2, %12 : vector<2x5x128xf32>
    %14 = vector.broadcast %3 : vector<1x1x128xf32> to vector<2x5x128xf32>
    %15 = arith.mulf %13, %14 : vector<2x5x128xf32>
    %16 = arith.mulf %15, %15 : vector<2x5x128xf32>
    %cst_10 = arith.constant dense<0.000000e+00> : vector<2x5xf32>
    %17 = vector.multi_reduction <add>, %16, %cst_10 [2] : vector<2x5x128xf32> to vector<2x5xf32>
    %18 = vector.shape_cast %17 : vector<2x5xf32> to vector<2x5x1xf32>
    %cst_11 = arith.constant dense<0.000000e+00> : vector<5x1xf32>
    %19 = vector.multi_reduction <add>, %18, %cst_11 [0] : vector<2x5x1xf32> to vector<5x1xf32>
    %20 = vector.shape_cast %19 : vector<5x1xf32> to vector<1x5x1xf32>
    %cst_12 = arith.constant 1.562500e-02 : f32
    %21 = vector.broadcast %cst_12 : f32 to vector<1x5x1xf32>
    %22 = arith.mulf %20, %21 : vector<1x5x1xf32>
    %23 = vector.broadcast %11 : vector<1x5x1xf32> to vector<2x5x128xf32>
    %24 = arith.subf %2, %23 : vector<2x5x128xf32>
    %cst_13 = arith.constant 9.99999974E-6 : f32
    %25 = vector.broadcast %cst_13 : f32 to vector<1x5x1xf32>
    %26 = arith.addf %22, %25 : vector<1x5x1xf32>
    %27 = math.rsqrt %26 : vector<1x5x1xf32>
    %28 = vector.broadcast %27 : vector<1x5x1xf32> to vector<2x5x128xf32>
    %29 = arith.mulf %24, %28 : vector<2x5x128xf32>
    %c0_14 = arith.constant 0 : index
    %c0_15 = arith.constant 0 : index
    %c0_16 = arith.constant 0 : index
    %30 = vector.load %arg2[%c0_14, %c0_15, %c0_16] : memref<1x5x1xf32, #tpu.memory_space<vmem>>, vector<1x5x1xf32>
    %31 = vector.broadcast %30 : vector<1x5x1xf32> to vector<2x5x128xf32>
    %32 = arith.mulf %29, %31 : vector<2x5x128xf32>
    %c0_17 = arith.constant 0 : index
    %c0_18 = arith.constant 0 : index
    %c0_19 = arith.constant 0 : index
    %33 = vector.load %arg3[%c0_17, %c0_18, %c0_19] : memref<1x5x1xf32, #tpu.memory_space<vmem>>, vector<1x5x1xf32>
    %34 = vector.broadcast %33 : vector<1x5x1xf32> to vector<2x5x128xf32>
    %35 = arith.addf %32, %34 : vector<2x5x128xf32>
    %c0_20 = arith.constant 0 : index
    %c0_21 = arith.constant 0 : index
    %c0_22 = arith.constant 0 : index
    %36 = vector.load %arg5[%c0_20, %c0_21, %c0_22] : memref<2x5x128xf32, #tpu.memory_space<vmem>>, vector<2x5x128xf32>
    tpu.vector_store %arg5[%c0_20, %c0_21, %c0_22], %35 {strides = array<i32>} : memref<2x5x128xf32, #tpu.memory_space<vmem>>, vector<2x5x128xf32>,
    return
  }
}

module attributes {stable_mosaic.version = 11 : i64} {
  func.func @kernel(%arg0: i32, %arg1: memref<36x1920xbf16, #tpu.memory_space<vmem>>, %arg2: memref<8x36xbf16, #tpu.memory_space<vmem>>, %arg3: memref<8x1xf32, #tpu.memory_space<vmem>>, %arg4: memref<8x128xbf16, #tpu.memory_space<vmem>>, %arg5: memref<1x128xf32, #tpu.memory_space<vmem>>, %arg6: memref<5x1920xbf16, #tpu.memory_space<vmem>>, %arg7: memref<1x5x128xf32, #tpu.memory_space<vmem>>) attributes {dimension_semantics = [#tpu.dimension_semantics<parallel>], iteration_bounds = array<i64: 4>, scalar_prefetch = 0 : i64, scratch_operands = 0 : i64, tpu.core_type = #tpu.core_type<tc>, window_params = [{transform_indices = @transform_0, window_bounds = array<i64: 36, 1920>}, {pipeline_mode = #tpu.pipeline_mode<synchronous>, transform_indices = @transform_1, window_bounds = array<i64: 8, 36>}, {pipeline_mode = #tpu.pipeline_mode<synchronous>, transform_indices = @transform_2, window_bounds = array<i64: 8, 1>}, {pipeline_mode = #tpu.pipeline_mode<synchronous>, transform_indices = @transform_3, window_bounds = array<i64: 8, 128>}, {pipeline_mode = #tpu.pipeline_mode<synchronous>, transform_indices = @transform_4, window_bounds = array<i64: 1, 128>}, {pipeline_mode = #tpu.pipeline_mode<synchronous>, transform_indices = @transform_5, window_bounds = array<i64: 5, 1920>}, {transform_indices = @transform_6, window_bounds = array<i64: 1, 5, 128>}]} {
    %c0 = arith.constant 0 : index
    %c0_0 = arith.constant 0 : index
    %0 = vector.load %arg1[%c0, %c0_0] : memref<36x1920xbf16, #tpu.memory_space<vmem>>, vector<36x1920xbf16>
    %c0_1 = arith.constant 0 : index
    %c0_2 = arith.constant 0 : index
    %1 = vector.load %arg2[%c0_1, %c0_2] : memref<8x36xbf16, #tpu.memory_space<vmem>>, vector<8x36xbf16>
    %cst = arith.constant dense<0.000000e+00> : vector<8x1920xf32>
    %2 = tpu.matmul %1, %0, %cst {dimension_numbers = #tpu.dot_dimension_numbers<[1], [0], [0], [1], [0, 0, 1, 1], [], []>} : vector<8x36xbf16>, vector<36x1920xbf16>, vector<8x1920xf32> -> vector<8x1920xf32>
    %c0_3 = arith.constant 0 : index
    %c0_4 = arith.constant 0 : index
    %3 = vector.load %arg3[%c0_3, %c0_4] : memref<8x1xf32, #tpu.memory_space<vmem>>, vector<8x1xf32>
    %4 = vector.broadcast %3 : vector<8x1xf32> to vector<8x1920xf32>
    %5 = arith.addf %2, %4 : vector<8x1920xf32>
    %cst_5 = arith.constant 0.000000e+00 : f32
    %6 = vector.broadcast %cst_5 : f32 to vector<8x1920xf32>
    %7 = arith.maximumf %5, %6 : vector<8x1920xf32>
    %8 = arith.truncf %7 : vector<8x1920xf32> to vector<8x1920xbf16>
    %c0_6 = arith.constant 0 : index
    %c0_7 = arith.constant 0 : index
    %9 = vector.load %arg6[%c0_6, %c0_7] : memref<5x1920xbf16, #tpu.memory_space<vmem>>, vector<5x1920xbf16>
    %cst_8 = arith.constant dense<0.000000e+00> : vector<8x5xf32>
    %10 = tpu.matmul %8, %9, %cst_8 {dimension_numbers = #tpu.dot_dimension_numbers<[1], [1], [0], [0], [0, 0, 1, 0], [], []>} : vector<8x1920xbf16>, vector<5x1920xbf16>, vector<8x5xf32> -> vector<8x5xf32>
    %cst_9 = arith.constant 3.906250e-03 : f32
    %11 = vector.broadcast %cst_9 : f32 to vector<8x5xf32>
    %12 = arith.mulf %10, %11 : vector<8x5xf32>
    %13 = arith.truncf %12 : vector<8x5xf32> to vector<8x5xbf16>
    %c0_10 = arith.constant 0 : index
    %c0_11 = arith.constant 0 : index
    %14 = vector.load %arg4[%c0_10, %c0_11] : memref<8x128xbf16, #tpu.memory_space<vmem>>, vector<8x128xbf16>
    %cst_12 = arith.constant dense<0.000000e+00> : vector<5x128xf32>
    %15 = tpu.matmul %13, %14, %cst_12 {dimension_numbers = #tpu.dot_dimension_numbers<[0], [0], [1], [1], [0, 1, 1, 1], [], []>} : vector<8x5xbf16>, vector<8x128xbf16>, vector<5x128xf32> -> vector<5x128xf32>
    %c0_13 = arith.constant 0 : index
    %c0_14 = arith.constant 0 : index
    %16 = vector.load %arg5[%c0_13, %c0_14] : memref<1x128xf32, #tpu.memory_space<vmem>>, vector<1x128xf32>
    %17 = vector.broadcast %16 : vector<1x128xf32> to vector<5x128xf32>
    %18 = arith.addf %15, %17 : vector<5x128xf32>
    %c0_15 = arith.constant 0 : index
    %c0_16 = arith.constant 0 : index
    %c0_17 = arith.constant 0 : index
    %19 = vector.load %arg7[%c0_15, %c0_16, %c0_17] : memref<1x5x128xf32, #tpu.memory_space<vmem>>, vector<1x5x128xf32>
    %20 = vector.shape_cast %19 : vector<1x5x128xf32> to vector<5x128xf32>
    %21 = vector.shape_cast %18 : vector<5x128xf32> to vector<1x5x128xf32>
    tpu.vector_store %arg7[%c0_15, %c0_16, %c0_17], %21 {strides = array<i32>} : memref<1x5x128xf32, #tpu.memory_space<vmem>>, vector<1x5x128xf32>,
    return
  }
  func.func @transform_0(%arg0: i32) -> (i32, i32) {
    %c0_i32 = arith.constant 0 : i32
    %c0_i32_0 = arith.constant 0 : i32
    return %c0_i32, %arg0 : i32, i32
  }
  func.func @transform_1(%arg0: i32) -> (i32, i32) {
    %c0_i32 = arith.constant 0 : i32
    %c0_i32_0 = arith.constant 0 : i32
    %c0_i32_1 = arith.constant 0 : i32
    return %c0_i32, %c0_i32_0 : i32, i32
  }
  func.func @transform_2(%arg0: i32) -> (i32, i32) {
    %c0_i32 = arith.constant 0 : i32
    %c0_i32_0 = arith.constant 0 : i32
    %c0_i32_1 = arith.constant 0 : i32
    return %c0_i32, %c0_i32_0 : i32, i32
  }
  func.func @transform_3(%arg0: i32) -> (i32, i32) {
    %c0_i32 = arith.constant 0 : i32
    %c0_i32_0 = arith.constant 0 : i32
    %c0_i32_1 = arith.constant 0 : i32
    return %c0_i32, %c0_i32_0 : i32, i32
  }
  func.func @transform_4(%arg0: i32) -> (i32, i32) {
    %c0_i32 = arith.constant 0 : i32
    %c0_i32_0 = arith.constant 0 : i32
    %c0_i32_1 = arith.constant 0 : i32
    return %c0_i32, %c0_i32_0 : i32, i32
  }
  func.func @transform_5(%arg0: i32) -> (i32, i32) {
    %c0_i32 = arith.constant 0 : i32
    %c0_i32_0 = arith.constant 0 : i32
    %c0_i32_1 = arith.constant 0 : i32
    return %c0_i32, %c0_i32_0 : i32, i32
  }
  func.func @transform_6(%arg0: i32) -> (i32, i32, i32) {
    %c0_i32 = arith.constant 0 : i32
    %c0_i32_0 = arith.constant 0 : i32
    %c0_i32_1 = arith.constant 0 : i32
    return %arg0, %c0_i32, %c0_i32_0 : i32, i32, i32
  }
}

</mosaic_0001>

<bundles_post_ra>
// kernel: gtask_forward.3
= control target key start
LH: loop header
LB: loop body
LE: loop exit
PB: predicated region body
PF: predicated region fallthrough
CT: control target
= control target key end

     0   :  { %vm35_vm0 = vcmask 1044480   ;;  %v94_v11 = vmov 0   ;;  %s160_s0 = inlined_call_operand.vmem [shape: f32[2,5,128], index: 0, kind: input, shape index: {}]   ;;  %s161_s1 = inlined_call_operand.vmem [shape: f32[2,5,128], index: 1, kind: input, shape index: {}]   ;;  %s162_s4 = inlined_call_operand.vmem [shape: f32[1,1,128], index: 4, kind: input, shape index: {}]   ;;  %s163_s2 = inlined_call_operand.vmem [shape: f32[1,5,1], index: 2, kind: input, shape index: {}]   ;;  %s164_s3 = inlined_call_operand.vmem [shape: f32[1,5,1], index: 3, kind: input, shape index: {}]   ;;  %s165_s5 = inlined_call_operand.vmem [shape: f32[2,5,128], index: 5, kind: output, shape index: {}]  }
   0x1   :  { %v20_v0 = vld [vmem:[%s160_s0] sm:$0x1f]  ;;  %v21_v4 = vld [vmem:[%s160_s0 + $0x8] sm:$0x1f]  ;;  %90 = vset.pattern.permute.xlu0 %v94_v11  ;;  %91 = vset.pattern.permute.xlu1 %v94_v11 }
   0x2   :  { %v22_v1 = vld [vmem:[%s161_s1] sm:$0x1f]  ;;  %v23_v5 = vld [vmem:[%s161_s1 + $0x8] sm:$0x1f] }
   0x3   :  { %v88_v2 = vld [vmem:[%s162_s4] ss:$0 sm:$0xff]  ;;  %v24_v3 = vsub.f32 %v20_v0, %v22_v1  ;;  %v25_v6 = vsub.f32 %v21_v4, %v23_v5 }
   0x4   :  { %v66_v12 = vld [vmem:[%s163_s2] sm:$0x1f] }
   0x5   :  { %v33_v7 = vmul.f32 %v88_v2, %v24_v3  ;;  %v34_v8 = vmul.f32 %v88_v2, %v25_v6  ;;  %v74_v27 = vld [vmem:[%s164_s3] sm:$0x1f] }
   0x7   :  { %v36_v9 = vsel %vm35_vm0, %v33_v7, 0.0  ;;  %v39_v10 = vsel %vm35_vm0, %v34_v8, 0.0 }
   0x8   :  { %37 = vadd.xlane.f32.xlu0 %v36_v9 }
   0xc   :  { %40 = vadd.xlane.f32.xlu0 %v39_v10 }
  0x22   :  { %69 = vperm.xlu0 %90, %v66_v12  }
  0x91   :  { %v38_v13 = vpop.xlane.xlu0 %37 }
  0x92   :  { %v42_v15 = vsel %vm35_vm0, %v38_v13, 0.0 }
  0x95   :  { %v41_v14 = vpop.xlane.xlu0 %40 }
  0x96   :  { %v43_v16 = vsel %vm35_vm0, %v41_v14, 0.0 }
  0x97   :  { %v44_v17 = vadd.f32 %v43_v16, %v42_v15 }
  0x99   :  { %v45_v18 = vmul.f32 0.015625, %v44_v17 }
  0x9b   :  { %v46_v19 = vsub.f32 %v24_v3, %v45_v18  ;;  %v47_v20 = vsub.f32 %v25_v6, %v45_v18 }
  0x9d   :  { %v48_v21 = vmul.f32 %v88_v2, %v46_v19  ;;  %v49_v22 = vmul.f32 %v88_v2, %v47_v20  ;;  %v70_v36 = vpop.permute.xlu0 %69 }
  0x9f   :  { %v50_v23 = vmul.f32 %v48_v21, %v48_v21  ;;  %v51_v25 = vmul.f32 %v49_v22, %v49_v22 }
  0xa1   :  { %v52_v24 = vsel %vm35_vm0, %v50_v23, 0.0  ;;  %v55_v26 = vsel %vm35_vm0, %v51_v25, 0.0 }
  0xa2   :  { %53 = vadd.xlane.f32.xlu1 %v52_v24 }
  0xa6   :  { %56 = vadd.xlane.f32.xlu1 %v55_v26 }
  0xb7   :  { %77 = vperm.xlu1 %91, %v74_v27  }
 0x12b   :  { %v54_v28 = vpop.xlane.xlu1 %53 }
 0x12c   :  { %v58_v30 = vsel %vm35_vm0, %v54_v28, 0.0 }
 0x12f   :  { %v57_v29 = vpop.xlane.xlu1 %56 }
 0x130   :  { %v59_v31 = vsel %vm35_vm0, %v57_v29, 0.0 }
 0x131   :  { %v60_v32 = vadd.f32 %v59_v31, %v58_v30 }
 0x133   :  { %v61_v33 = vmul.f32 0.015625, %v60_v32  ;;  %v78_v39 = vpop.permute.xlu1 %77 }
 0x135   :  { %v62_v34 = vadd.f32 1e-05, %v61_v33 }
 0x137   :  { %92 = vrsqrt.f32 %v62_v34 }
 0x144   :  { %v93_v35 = vpop.eup %92 }
 0x145   :  { %v64_v37 = vmul.f32 %v93_v35, %v46_v19  ;;  %v65_v38 = vmul.f32 %v93_v35, %v47_v20 }
 0x147   :  { %v72_v40 = vmul.f32 %v70_v36, %v64_v37  ;;  %v73_v41 = vmul.f32 %v70_v36, %v65_v38 }
 0x149   :  { %v80_v42 = vadd.f32 %v78_v39, %v72_v40  ;;  %v81_v43 = vadd.f32 %v78_v39, %v73_v41 }
 0x14b   :  { %82 = vst [vmem:[%s165_s5] sm:$0x1f] %v80_v42  ;;  %83 = vst [vmem:[%s165_s5 + $0x8] sm:$0x1f] %v81_v43 }

// kernel: gtask_forward.2
= control target key start
LH: loop header
LB: loop body
LE: loop exit
PB: predicated region body
PF: predicated region fallthrough
CT: control target
= control target key end

     0   :  { %s1816_s21 = smov 0   ;;  %s1818_s22 = smov 0   ;;  %s2099_s0 = inlined_call_operand.vmem [shape: bf16[36,7680], index: 0, kind: input, shape index: {}]   ;;  %s2100_s1 = inlined_call_operand.vmem [shape: bf16[8,36], index: 1, kind: input, shape index: {}]   ;;  %s2101_s2 = inlined_call_operand.vmem [shape: f32[8,1], index: 2, kind: input, shape index: {}]   ;;  %s2102_s3 = inlined_call_operand.vmem [shape: bf16[8,128], index: 3, kind: input, shape index: {}]   ;;  %s2103_s4 = inlined_call_operand.vmem [shape: f32[1,128], index: 4, kind: input, shape index: {}]   ;;  %s2104_s5 = inlined_call_operand.vmem [shape: bf16[5,1920], index: 5, kind: input, shape index: {}]   ;;  %s2105_s6 = inlined_call_operand.vmem [shape: f32[4,5,128], index: 6, kind: output, shape index: {}]  }
   0x1   :  { %s1820_s23 = smov 0  }
   0x2 LB: > { %s1523_s24 = sadd.s32 4294967295, %s1776_s23   ;;  %s1833_s25 = sadd.s32 1, %s1776_s23   ;;  %s1776_s23 = sphi %s1820_s23, %s2108_s23   ;;  %s1772_s22 = sphi %s1818_s22, %s2107_s22   ;;  %s1768_s21 = sphi %s1816_s21, %s2106_s21  }
   0x3   : > { %s20_s26 = ssub.s32 %s1776_s23, %s1833_s25  ;;  %s23_s27 = sadd.s32 1, %s1772_s22 }
   0x4   : > { %p21_p0 = scmp.eq.s32.totalorder %s20_s26, 0  ;;  %p30_p1 = scmp.ne.s32.totalorder %s1772_s22, %s1768_s21 }
   0x5   : > { %p31_p2 = scmp.eq.s32.totalorder %s1776_s23, 0  ;;  %p1526_p4 = scmp.ge.s32.totalorder %s1776_s23, 4 }
   0x6   : > { %s1842_s28 = scalar_select %p21_p0, %s1772_s22, %s23_s27  }
   0x7   : > { %p32_p3 = por %p31_p2, %p30_p1  ;;  %202 = sbr.rel (%p1526_p4) target bundleno = 38 (0x26), region = 36 }
   0xc   : > { %205 = sbr.rel (!%p32_p3) target bundleno = 38 (0x26), region = 40  ;;  %s207_s29 = sand.u32 (%p32_p3), 1, %s1772_s22  }
   0xd   : > { %s1619_s30 = smul.u32 (%p32_p3), 60, %s1776_s23 }
   0xe   : > { %s1650_s7 = smul.u32 (%p32_p3), 300, %s207_s29 }
   0xf   : > { %s1850_s10 = scalar_lea.vmem (%p32_p3), %s2099_s0, %s1619_s30 }
  0x10   : > { %v227_v0 = vld [vmem:[%s1850_s10] sm:$0xff] (%p32_p3)  ;;  %v229_v1 = vld [vmem:[%s1850_s10 + $0x8] sm:$0xff] (%p32_p3)  ;;  %v231_v2 = vld [vmem:[%s1850_s10 + $0x10] sm:$0xff] (%p32_p3)  ;;  %s1855_s11 = scalar_lea.vmem (%p32_p3), [#allocation2], %s1650_s7 }
  0x11   : > { %228 = vst [vmem:[%s1855_s11] sm:$0xff] %v227_v0  ;;  %230 = vst [vmem:[%s1855_s11 + $0x8] sm:$0xff] %v229_v1  ;;  %v233_v3 = vld [vmem:[%s1850_s10 + $0x18] sm:$0xff]  ;;  %v235_v4 = vld [vmem:[%s1850_s10 + $0x20] sm:$0xff] }
  0x12   : > { %232 = vst [vmem:[%s1855_s11 + $0x10] sm:$0xff] %v231_v2  ;;  %v237_v5 = vld [vmem:[%s1850_s10 + $0x28] sm:$0xff]  ;;  %234 = vst [vmem:[%s1855_s11 + $0x18] sm:$0xff] %v233_v3  ;;  %v239_v6 = vld [vmem:[%s1850_s10 + $0x30] sm:$0xff] }
  0x13   : > { %236 = vst [vmem:[%s1855_s11 + $0x20] sm:$0xff] %v235_v4  ;;  %238 = vst [vmem:[%s1855_s11 + $0x28] sm:$0xff] %v237_v5  ;;  %v241_v7 = vld [vmem:[%s1850_s10 + $0xf0] sm:$0xff]  ;;  %v243_v8 = vld [vmem:[%s1850_s10 + $0xf8] sm:$0xff] }
  0x14   : > { %240 = vst [vmem:[%s1855_s11 + $0x30] sm:$0xff] %v239_v6  ;;  %242 = vst [vmem:[%s1855_s11 + $0x3c] sm:$0xff] %v241_v7  ;;  %v245_v9 = vld [vmem:[%s1850_s10 + $0x100] sm:$0xff]  ;;  %v247_v10 = vld [vmem:[%s1850_s10 + $0x108] sm:$0xff] }
  0x15   : > { %244 = vst [vmem:[%s1855_s11 + $0x44] sm:$0xff] %v243_v8  ;;  %v249_v11 = vld [vmem:[%s1850_s10 + $0x110] sm:$0xff]  ;;  %246 = vst [vmem:[%s1855_s11 + $0x4c] sm:$0xff] %v245_v9  ;;  %v251_v12 = vld [vmem:[%s1850_s10 + $0x118] sm:$0xff] }
  0x16   : > { %248 = vst [vmem:[%s1855_s11 + $0x54] sm:$0xff] %v247_v10  ;;  %250 = vst [vmem:[%s1855_s11 + $0x5c] sm:$0xff] %v249_v11  ;;  %v253_v13 = vld [vmem:[%s1850_s10 + $0x120] sm:$0xff]  ;;  %v257_v15 = vld [vmem:[%s1850_s10 + $0x1e8] sm:$0xff] }
  0x17   : > { %v255_v14 = vld [vmem:[%s1850_s10 + $0x1e0] sm:$0xff]  ;;  %252 = vst [vmem:[%s1855_s11 + $0x64] sm:$0xff] %v251_v12  ;;  %254 = vst [vmem:[%s1855_s11 + $0x6c] sm:$0xff] %v253_v13  ;;  %v259_v16 = vld [vmem:[%s1850_s10 + $0x1f0] sm:$0xff] }
  0x18   : > { %256 = vst [vmem:[%s1855_s11 + $0x78] sm:$0xff] %v255_v14  ;;  %v261_v17 = vld [vmem:[%s1850_s10 + $0x1f8] sm:$0xff]  ;;  %258 = vst [vmem:[%s1855_s11 + $0x80] sm:$0xff] %v257_v15  ;;  %v263_v18 = vld [vmem:[%s1850_s10 + $0x200] sm:$0xff] }
  0x19   : > { %260 = vst [vmem:[%s1855_s11 + $0x88] sm:$0xff] %v259_v16  ;;  %262 = vst [vmem:[%s1855_s11 + $0x90] sm:$0xff] %v261_v17  ;;  %v265_v19 = vld [vmem:[%s1850_s10 + $0x208] sm:$0xff]  ;;  %v267_v20 = vld [vmem:[%s1850_s10 + $0x210] sm:$0xff] }
  0x1a   : > { %264 = vst [vmem:[%s1855_s11 + $0x98] sm:$0xff] %v263_v18  ;;  %266 = vst [vmem:[%s1855_s11 + $0xa0] sm:$0xff] %v265_v19  ;;  %v269_v21 = vld [vmem:[%s1850_s10 + $0x2d0] sm:$0xff]  ;;  %v271_v22 = vld [vmem:[%s1850_s10 + $0x2d8] sm:$0xff] }
  0x1b   : > { %268 = vst [vmem:[%s1855_s11 + $0xa8] sm:$0xff] %v267_v20  ;;  %v273_v23 = vld [vmem:[%s1850_s10 + $0x2e0] sm:$0xff]  ;;  %270 = vst [vmem:[%s1855_s11 + $0xb4] sm:$0xff] %v269_v21  ;;  %v275_v24 = vld [vmem:[%s1850_s10 + $0x2e8] sm:$0xff] }
  0x1c   : > { %272 = vst [vmem:[%s1855_s11 + $0xbc] sm:$0xff] %v271_v22  ;;  %274 = vst [vmem:[%s1855_s11 + $0xc4] sm:$0xff] %v273_v23  ;;  %v277_v25 = vld [vmem:[%s1850_s10 + $0x2f0] sm:$0xff]  ;;  %v279_v26 = vld [vmem:[%s1850_s10 + $0x2f8] sm:$0xff] }
  0x1d   : > { %276 = vst [vmem:[%s1855_s11 + $0xcc] sm:$0xff] %v275_v24  ;;  %278 = vst [vmem:[%s1855_s11 + $0xd4] sm:$0xff] %v277_v25  ;;  %v281_v27 = vld [vmem:[%s1850_s10 + $0x300] sm:$0xff]  ;;  %v285_v29 = vld [vmem:[%s1850_s10 + $0x3c8] sm:$0xff] }
  0x1e   : > { %280 = vst [vmem:[%s1855_s11 + $0xdc] sm:$0xff] %v279_v26  ;;  %v283_v28 = vld [vmem:[%s1850_s10 + $0x3c0] sm:$0xff]  ;;  %282 = vst [vmem:[%s1855_s11 + $0xe4] sm:$0xff] %v281_v27  ;;  %v287_v30 = vld [vmem:[%s1850_s10 + $0x3d0] sm:$0xff] }
  0x1f   : > { %284 = vst [vmem:[%s1855_s11 + $0xf0] sm:$0xff] %v283_v28  ;;  %286 = vst [vmem:[%s1855_s11 + $0xf8] sm:$0xff] %v285_v29  ;;  %v289_v31 = vld [vmem:[%s1850_s10 + $0x3d8] sm:$0xff]  ;;  %v291_v32 = vld [vmem:[%s1850_s10 + $0x3e0] sm:$0xff] }
  0x20   : > { %288 = vst [vmem:[%s1855_s11 + $0x100] sm:$0xff] %v287_v30  ;;  %290 = vst [vmem:[%s1855_s11 + $0x108] sm:$0xff] %v289_v31  ;;  %v293_v33 = vld [vmem:[%s1850_s10 + $0x3e8] sm:$0xff]  ;;  %v295_v34 = vld [vmem:[%s1850_s10 + $0x3f0] sm:$0xff] }
  0x21   : > { %292 = vst [vmem:[%s1855_s11 + $0x110] sm:$0xff] %v291_v32  ;;  %v1528_v35 = vld [vmem:[%s1850_s10 + $0x38] sm:$0xf]  ;;  %294 = vst [vmem:[%s1855_s11 + $0x118] sm:$0xff] %v293_v33  ;;  %v1530_v36 = vld [vmem:[%s1850_s10 + $0x128] sm:$0xf] }
  0x22   : > { %296 = vst [vmem:[%s1855_s11 + $0x120] sm:$0xff] %v295_v34  ;;  %1529 = vst [vmem:[%s1855_s11 + $0x38] sm:$0xf] %v1528_v35  ;;  %v1532_v37 = vld [vmem:[%s1850_s10 + $0x218] sm:$0xf] }
  0x23   : > { %v1534_v38 = vld [vmem:[%s1850_s10 + $0x308] sm:$0xf]  ;;  %1531 = vst [vmem:[%s1855_s11 + $0x74] sm:$0xf] %v1530_v36  ;;  %1533 = vst [vmem:[%s1855_s11 + $0xb0] sm:$0xf] %v1532_v37 }
  0x24   : > { %1535 = vst [vmem:[%s1855_s11 + $0xec] sm:$0xf] %v1534_v38  ;;  %v1536_v39 = vld [vmem:[%s1850_s10 + $0x3f8] sm:$0xf] }
  0x25   : > { %1537 = vst [vmem:[%s1855_s11 + $0x128] sm:$0xf] %v1536_v39 }
  0x26 PF: > { %p1538_p5 = scmp.ge.s32.totalorder %s1776_s23, 1  ;;  %p319_p6 = scmp.lt.s32.totalorder %s1776_s23, 5 }
  0x28   : > { %p320_p7 = pnand %p1538_p5, %p319_p6 }
  0x29   : > { %s326_s12 = sand.u32 (!%p320_p7), 1, %s1768_s21   ;;  %p355_p8 = scmp.lt.s32.totalorder (!%p320_p7), %s1523_s24, 3 }
  0x2a   : > { %323 = sbr.rel (%p320_p7) target bundleno = 800 (0x320), region = 66 }
  0x2b   : > { %s1651_s13 = smul.u32 (!%p320_p7), 300, %s326_s12 }
  0x2d   : > { %s1943_s16 = scalar_lea.vmem (!%p320_p7), [#allocation2], %s1651_s13 }
  0x2f   : > { %v1778_v40 = vmov 0   ;;  %v401_v41 = vld [vmem:[%s2101_s2] sm:$0xff]  ;;  %vm601_vm0 = vcmask 1041408   ;;  %v1692_v55 = vld [vmem:[%s1943_s16 + $0xc] ss:$60 sps:$4 sm:$0xff]   ;;  %vm597_vm1 = vcmask 293888  }
  0x30   : > { %679 = vmatprep.mubr.bf16.mxu0 %v1778_v40  ;;  %720 = vmatprep.mubr.bf16.mxu1 %v1778_v40  ;;  %v392_v42 = vld [vmem:[%s1943_s16 + $0xf0] sm:$0x33]  ;;  %v393_v43 = vld [vmem:[%s1943_s16 + $0xf8] sm:$0x33]  ;;  %v1686_v49 = vld [vmem:[%s1943_s16 + $0x84] ss:$60 sps:$4 sm:$0xff]  }
  0x31   : > { %1679 = vset.pattern.permute.xlu0 %v1778_v40  ;;  %v1571_v44 = vcombine.high %v392_v42, %v392_v42  ;;  %v1573_v45 = vcombine.high %v393_v43, %v393_v43  ;;  %v1570_v46 = vcombine.low %v392_v42, %v392_v42  ;;  %v1572_v47 = vcombine.low %v393_v43, %v393_v43  ;;  %v1684_v48 = vld [vmem:[%s1943_s16 + $0x7c] ss:$60 sps:$4 sm:$0xff]   ;;  %v1690_v54 = vld [vmem:[%s1943_s16 + $0x4] ss:$60 sps:$4 sm:$0xff]   ;;  %v395_v57 = vld [vmem:[%s1943_s16 + $0x108] sm:$0x33] }
  0x32   : > { %404 = vperm.xlu0 %1679, %v401_v41   ;;  %v1688_v52 = vld [vmem:[%s1943_s16 + $0x78] ss:$60 sps:$4 sm:$0xff]   ;;  %v1689_v53 = vld [vmem:[%s1943_s16 + $0x80] ss:$60 sps:$4 sm:$0xff]   ;;  %v1695_v59 = vld [vmem:[%s1943_s16 + $0x8] ss:$60 sps:$4 sm:$0xff]   ;;  %v1577_v61 = vcombine.high %v395_v57, %v395_v57  ;;  %v1576_v63 = vcombine.low %v395_v57, %v395_v57 }
  0x33   : > { %1585 = vmatprep.subr.msk.bf16.mxu0 %vm601_vm0, %v1571_v44  ;;  %1587 = vmatprep.subr.msk.bf16.mxu1 %vm601_vm0, %v1573_v45  ;;  %v603_v50 = vsel %vm601_vm0, %v1570_v46, 0  ;;  %v609_v51 = vsel %vm601_vm0, %v1572_v47, 0  ;;  %v394_v56 = vld [vmem:[%s1943_s16 + $0x100] sm:$0x33]  ;;  %v1702_v1 = vld [vmem:[%s1943_s16 + $0x8c] ss:$60 sps:$4 sm:$0xff]  }
  0x34   : > { %658 = vmatpush1.bf16.msra.mxu0 %v603_v50  ;;  %699 = vmatpush1.bf16.msra.mxu1 %v609_v51  ;;  %v1694_v58 = vld [vmem:[%s1943_s16] ss:$60 sps:$4 sm:$0xff]   ;;  %v1575_v60 = vcombine.high %v394_v56, %v394_v56  ;;  %v1574_v62 = vcombine.low %v394_v56, %v394_v56  ;;  %v621_v3 = vsel %vm601_vm0, %v1576_v63, 0  ;;  %v1705_v4 = vld [vmem:[%s1943_s16 + $0x94] ss:$60 sps:$4 sm:$0xff]   ;;  %v1779_v31 = vmov 0.0  }
  0x35   : > { %659 = vmatprep.subr.bf16.mxu0 %v1684_v48  ;;  %700 = vmatprep.subr.bf16.mxu1 %v1686_v49  ;;  %v1964_v0 = vld [vmem:[%s2100_s1] sm:$0xf]  ;;  %v1700_v5 = vld [vmem:[%s1943_s16 + $0x88] ss:$60 sps:$4 sm:$0xff]   ;;  %v1703_v6 = vld [vmem:[%s1943_s16 + $0x90] ss:$60 sps:$4 sm:$0xff]  }
  0x36   : > { %v615_v2 = vsel %vm601_vm0, %v1574_v62, 0  ;;  %v1708_v7 = vld [vmem:[%s1943_s16 + $0x14] ss:$60 sps:$4 sm:$0xff]   ;;  %v1711_v8 = vld [vmem:[%s1943_s16 + $0x1c] ss:$60 sps:$4 sm:$0xff]   ;;  %vm1780_vm2 = vmmov 0  }
  0x37   : > { %v396_v9 = vld [vmem:[%s1943_s16 + $0x110] sm:$0x33]  ;;  %v397_v10 = vld [vmem:[%s1943_s16 + $0x118] sm:$0x33]  ;;  %v1721_v20 = vld [vmem:[%s1943_s16 + $0xa4] ss:$60 sps:$4 sm:$0xff]  }
  0x38   : > { %660 = vmatpush1.bf16.msra.mxu0 %v1688_v52  ;;  %701 = vmatpush1.bf16.msra.mxu1 %v1689_v53  ;;  %v1706_v11 = vld [vmem:[%s1943_s16 + $0x10] ss:$60 sps:$4 sm:$0xff]   ;;  %v1709_v12 = vld [vmem:[%s1943_s16 + $0x18] ss:$60 sps:$4 sm:$0xff]   ;;  %v1579_v13 = vcombine.high %v396_v9, %v396_v9  ;;  %v1581_v14 = vcombine.high %v397_v10, %v397_v10  ;;  %v1578_v15 = vcombine.low %v396_v9, %v396_v9  ;;  %v1719_v22 = vld [vmem:[%s1943_s16 + $0xa0] ss:$60 sps:$4 sm:$0xff]  }
  0x39   : > { %661 = vmatprep.subr.bf16.mxu0 %v1690_v54  ;;  %702 = vmatprep.subr.bf16.mxu1 %v1692_v55  ;;  %v1580_v16 = vcombine.low %v397_v10, %v397_v10  ;;  %v1718_v19 = vld [vmem:[%s1943_s16 + $0x9c] ss:$60 sps:$4 sm:$0xff]   ;;  %v1724_v23 = vld [vmem:[%s1943_s16 + $0x24] ss:$60 sps:$4 sm:$0xff]   ;;  %v1727_v24 = vld [vmem:[%s1943_s16 + $0x2c] ss:$60 sps:$4 sm:$0xff]  }
  0x3a   : > { %v627_v17 = vsel %vm601_vm0, %v1578_v15, 0  ;;  %v1716_v21 = vld [vmem:[%s1943_s16 + $0x98] ss:$60 sps:$4 sm:$0xff]   ;;  %v398_v25 = vld [vmem:[%s1943_s16 + $0x120] sm:$0x33]  ;;  %vm1415_vm3 = vcmask 1043456  }
  0x3b   : > { %v633_v18 = vsel %vm601_vm0, %v1580_v16, 0  ;;  %v1722_v26 = vld [vmem:[%s1943_s16 + $0x20] ss:$60 sps:$4 sm:$0xff]   ;;  %v1725_v27 = vld [vmem:[%s1943_s16 + $0x28] ss:$60 sps:$4 sm:$0xff]   ;;  %v1583_v28 = vcombine.high %v398_v25, %v398_v25  ;;  %v1582_v29 = vcombine.low %v398_v25, %v398_v25  ;;  %vm1411_vm4 = vcmask 64512  }
  0x3c   : > { %662 = vmatpush1.bf16.msra.mxu0 %v1694_v58  ;;  %703 = vmatpush1.bf16.msra.mxu1 %v1695_v59  ;;  %v1730_v30 = vld [vmem:[%s1943_s16 + $0x128] ss:$0 sps:$4 sm:$0x33]   ;;  %v1734_v36 = vld [vmem:[%s1943_s16 + $0xb0] ss:$60 sps:$4 sm:$0xff]   ;;  %s2110_s24 = smov (!%p355_p8, %s1523_s24), 3 }
  0x3d   : > { %1589 = vmatprep.subr.msk.bf16.mxu0 %vm601_vm0, %v1575_v60  ;;  %1591 = vmatprep.subr.msk.bf16.mxu1 %vm601_vm0, %v1577_v61  ;;  %v639_v32 = vsel %vm601_vm0, %v1582_v29, 0  ;;  %v645_v33 = vsel %vm601_vm0, %v1730_v30, 0  ;;  %v1733_v34 = vld [vmem:[%s1943_s16 + $0xac] ss:$60 sps:$4 sm:$0xff]   ;;  %v1737_v37 = vld [vmem:[%s1943_s16 + $0x34] ss:$60 sps:$4 sm:$0xff]  }
  0x3e   : > { %v1731_v35 = vld [vmem:[%s1943_s16 + $0xa8] ss:$60 sps:$4 sm:$0xff]   ;;  %v1735_v38 = vld [vmem:[%s1943_s16 + $0x30] ss:$60 sps:$4 sm:$0xff]   ;;  %v1738_v39 = vld [vmem:[%s1943_s16 + $0x38] ss:$60 sps:$4 sm:$0xff]  }
  0x3f   : > { %1586 = vmatmul.mubr.msk.bf16.vlgmr.msra.gmra.mxu0 %vm597_vm1, %v1964_v0  ;;  %1588 = vmatmul.mubr.msk.bf16.vlgmr.msra.gmra.mxu1 %vm597_vm1, %v1964_v0  ;;  %v1005_v41 = vld [vmem:[%s2104_s5 + $0x8] sm:$0x77]  ;;  %v1006_v46 = vld [vmem:[%s2104_s5 + $0x10] sm:$0x77]  ;;  %v1007_v47 = vld [vmem:[%s2104_s5 + $0x18] sm:$0x77] }
  0x40   : > { %740 = vmatpush1.bf16.msra.mxu0 %v615_v2  ;;  %781 = vmatpush1.bf16.msra.mxu1 %v621_v3  ;;  %v1603_v43 = vcombine.high %v1005_v41, %v1005_v41  ;;  %v1602_v45 = vcombine.low %v1005_v41, %v1005_v41  ;;  %v1605_v48 = vcombine.high %v1006_v46, %v1006_v46  ;;  %v1009_v2 = vld [vmem:[%s2104_s5 + $0x28] sm:$0x77]  ;;  %s1539_s18 = sshll.u32 %s2110_s24, 3 }
  0x41   : > { %741 = vmatprep.subr.bf16.mxu0 %v1702_v1  ;;  %782 = vmatprep.subr.bf16.mxu1 %v1705_v4  ;;  %v1607_v49 = vcombine.high %v1007_v47, %v1007_v47  ;;  %v1008_v1 = vld [vmem:[%s2104_s5 + $0x20] sm:$0x77]  ;;  %v1606_v9 = vcombine.low %v1007_v47, %v1007_v47  ;;  %s358_s27 = scalar_lea.vmem %s2105_s6, %s1539_s18 }
  0x42   : > { %761 = vmatprep.mubr.bf16.mxu0 %v1778_v40  ;;  %802 = vmatprep.mubr.bf16.mxu1 %v1778_v40 }
  0x44   : > { %742 = vmatpush1.bf16.msra.mxu0 %v1700_v5  ;;  %783 = vmatpush1.bf16.msra.mxu1 %v1703_v6 }
  0x45   : > { %743 = vmatprep.subr.bf16.mxu0 %v1708_v7  ;;  %784 = vmatprep.subr.bf16.mxu1 %v1711_v8  ;;  %v1604_v8 = vcombine.low %v1006_v46, %v1006_v46 }
  0x48   : > { %744 = vmatpush1.bf16.msra.mxu0 %v1706_v11  ;;  %785 = vmatpush1.bf16.msra.mxu1 %v1709_v12  ;;  %v1609_v11 = vcombine.high %v1008_v1, %v1008_v1  ;;  %v1611_v12 = vcombine.high %v1009_v2, %v1009_v2 }
  0x49   : > { %1593 = vmatprep.subr.msk.bf16.mxu0 %vm601_vm0, %v1579_v13  ;;  %1595 = vmatprep.subr.msk.bf16.mxu1 %vm601_vm0, %v1581_v14 }
  0x4b   : > { %1590 = vmatmul.mubr.msk.bf16.vlgmr.msra.gmra.mxu0 %vm597_vm1, %v1964_v0  ;;  %1592 = vmatmul.mubr.msk.bf16.vlgmr.msra.gmra.mxu1 %vm597_vm1, %v1964_v0 }
  0x4c   : > { %822 = vmatpush1.bf16.msra.mxu0 %v627_v17  ;;  %863 = vmatpush1.bf16.msra.mxu1 %v633_v18 }
  0x4d   : > { %823 = vmatprep.subr.bf16.mxu0 %v1718_v19  ;;  %864 = vmatprep.subr.bf16.mxu1 %v1721_v20 }
  0x4e   : > { %843 = vmatprep.mubr.bf16.mxu0 %v1778_v40  ;;  %884 = vmatprep.mubr.bf16.mxu1 %v1778_v40 }
  0x50   : > { %824 = vmatpush1.bf16.msra.mxu0 %v1716_v21  ;;  %865 = vmatpush1.bf16.msra.mxu1 %v1719_v22 }
  0x51   : > { %825 = vmatprep.subr.bf16.mxu0 %v1724_v23  ;;  %866 = vmatprep.subr.bf16.mxu1 %v1727_v24 }
  0x54   : > { %826 = vmatpush1.bf16.msra.mxu0 %v1722_v26  ;;  %867 = vmatpush1.bf16.msra.mxu1 %v1725_v27  ;;  %v1010_v27 = vld [vmem:[%s2104_s5 + $0x30] sm:$0x77] }
  0x55   : > { %1597 = vmatprep.subr.msk.bf16.mxu0 %vm601_vm0, %v1583_v28  ;;  %1628 = vmatprep.subr.bf16.mxu1 %v1779_v31 }
  0x57   : > { %1594 = vmatmul.mubr.msk.bf16.vlgmr.msra.gmra.mxu0 %vm597_vm1, %v1964_v0  ;;  %1596 = vmatmul.mubr.msk.bf16.vlgmr.msra.gmra.mxu1 %vm597_vm1, %v1964_v0 }
  0x58   : > { %904 = vmatpush1.bf16.msra.mxu0 %v639_v32  ;;  %1629 = vmatpush3.bf16.msra.mxu1 %v645_v33 }
  0x59   : > { %905 = vmatprep.subr.bf16.mxu0 %v1733_v34  ;;  %1630 = vmatprep.subr.bf16.mxu1 %v1779_v31  ;;  %v1608_v34 = vcombine.low %v1008_v1, %v1008_v1 }
  0x5a   : > { %925 = vmatprep.mubr.bf16.mxu0 %v1778_v40  ;;  %1634 = vmatprep.mubr.msk.bf16.mxu1 %vm1780_vm2, %v1779_v31  ;;  %v1004_v40 = vld [vmem:[%s2104_s5] sm:$0x77] }
  0x5b   : > { %v1601_v42 = vcombine.high %v1004_v40, %v1004_v40  ;;  %v1600_v44 = vcombine.low %v1004_v40, %v1004_v40 }
  0x5c   : > { %906 = vmatpush1.bf16.msra.mxu0 %v1731_v35  ;;  %1631 = vmatpush3.bf16.msra.mxu1 %v1734_v36  ;;  %v1610_v35 = vcombine.low %v1009_v2, %v1009_v2 }
  0x5d   : > { %907 = vmatprep.subr.bf16.mxu0 %v1737_v37  ;;  %1632 = vmatprep.subr.bf16.mxu1 %v1779_v31  ;;  %v1613_v37 = vcombine.high %v1010_v27, %v1010_v27 }
  0x60   : > { %908 = vmatpush1.bf16.msra.mxu0 %v1735_v38  ;;  %1633 = vmatpush3.bf16.msra.mxu1 %v1738_v39 }
  0x61   : > { %1079 = vmatprep.subr.bf16.mxu0 %v1601_v42  ;;  %1119 = vmatprep.subr.bf16.mxu1 %v1603_v43 }
  0x63   : > { %1598 = vmatmul.mubr.msk.bf16.vlgmr.msra.gmra.mxu0 %vm597_vm1, %v1964_v0  ;;  %1635 = vmatmul.mubr.msk.bf16.vlgmr.msra.gmra.mxu1 %vm597_vm1, %v1964_v0 }
  0x64   : > { %1080 = vmatpush1.bf16.xpose.msra.mxu0 %v1600_v44  ;;  %1120 = vmatpush1.bf16.xpose.msra.mxu1 %v1602_v45 }
  0x65   : > { %1159 = vmatprep.subr.bf16.mxu0 %v1605_v48  ;;  %1199 = vmatprep.subr.bf16.mxu1 %v1607_v49 }
  0xad   : > { %v2041_v50 = vpop.permute.xlu0 %404 }
  0xff   : > { %v681_v51 = vpop.f32.mrf.mxu0  ;;  %v722_v52 = vpop.f32.mrf.mxu1 }
 0x100   : > { %v682_v53 = vadd.f32 %v681_v51, %v2041_v50  ;;  %v723_v54 = vadd.f32 %v722_v52, %v2041_v50 }
 0x101   : > { %v683_v55 = vpop.f32.mrf.mxu0  ;;  %v724_v56 = vpop.f32.mrf.mxu1 }
 0x102   : > { %v684_v57 = vadd.f32 %v683_v55, %v2041_v50  ;;  %v725_v58 = vadd.f32 %v724_v56, %v2041_v50  ;;  %v976_v59 = vmax.f32 %v723_v54, 0.0  ;;  %v974_v62 = vmax.f32 %v682_v53, 0.0 }
 0x103   : > { %v685_v60 = vpop.f32.mrf.mxu0  ;;  %v726_v61 = vpop.f32.mrf.mxu1 }
 0x104   : > { %v975_v63 = vmax.f32 %v684_v57, 0.0  ;;  %v977_v0 = vmax.f32 %v725_v58, 0.0  ;;  %v991_v5 = vpack.c.bf16 %v976_v59, %v976_v59  ;;  %v989_v10 = vpack.c.bf16 %v974_v62, %v974_v62  ;;  %v1751_v57 = vld [vmem:[%s2104_s5 + $0x38] ss:$0 sps:$4 sm:$0x77]  }
 0x105   : > { %v686_v3 = vpop.f32.mrf.mxu0  ;;  %v727_v4 = vpop.f32.mrf.mxu1  ;;  %v1612_v58 = vcombine.low %v1010_v27, %v1010_v27 }
 0x106   : > { %v990_v6 = vpack.c.bf16 %v975_v63, %v975_v63  ;;  %v992_v7 = vpack.c.bf16 %v977_v0, %v977_v0 }
 0x108   : > { %1097 = vmatprep.mubr.bf16.mxu0 %v990_v6  ;;  %1137 = vmatprep.mubr.bf16.mxu1 %v992_v7 }
 0x109   : > { %1098 = vmatmul.mubr.bf16.vlgmr.msra.gmra.mxu0 %v989_v10  ;;  %1138 = vmatmul.mubr.bf16.vlgmr.msra.gmra.mxu1 %v991_v5 }
 0x10a   : > { %1160 = vmatpush1.bf16.xpose.msra.mxu0 %v1604_v8  ;;  %1200 = vmatpush1.bf16.xpose.msra.mxu1 %v1606_v9 }
 0x10b   : > { %v763_v13 = vpop.f32.mrf.mxu0  ;;  %v804_v14 = vpop.f32.mrf.mxu1  ;;  %1239 = vmatprep.subr.bf16.mxu0 %v1609_v11  ;;  %1279 = vmatprep.subr.bf16.mxu1 %v1611_v12 }
 0x10c   : > { %v764_v15 = vadd.f32 %v763_v13, %v2041_v50  ;;  %v805_v16 = vadd.f32 %v804_v14, %v2041_v50  ;;  %v1387_v14 = vld [vmem:[%s2102_s3] sm:$0xf] }
 0x10d   : > { %v765_v17 = vpop.f32.mrf.mxu0  ;;  %v806_v18 = vpop.f32.mrf.mxu1 }
 0x10e   : > { %v980_v19 = vmax.f32 %v805_v16, 0.0  ;;  %v766_v20 = vadd.f32 %v765_v17, %v2041_v50  ;;  %v807_v21 = vadd.f32 %v806_v18, %v2041_v50  ;;  %v978_v22 = vmax.f32 %v764_v15, 0.0 }
 0x10f   : > { %v767_v23 = vpop.f32.mrf.mxu0  ;;  %v808_v24 = vpop.f32.mrf.mxu1 }
 0x110   : > { %v979_v25 = vmax.f32 %v766_v20, 0.0  ;;  %v981_v26 = vmax.f32 %v807_v21, 0.0  ;;  %v995_v28 = vpack.c.bf16 %v980_v19, %v980_v19  ;;  %v993_v36 = vpack.c.bf16 %v978_v22, %v978_v22 }
 0x111   : > { %v768_v29 = vpop.f32.mrf.mxu0  ;;  %v809_v30 = vpop.f32.mrf.mxu1 }
 0x112   : > { %v994_v32 = vpack.c.bf16 %v979_v25, %v979_v25  ;;  %v996_v33 = vpack.c.bf16 %v981_v26, %v981_v26 }
 0x114   : > { %1177 = vmatprep.mubr.bf16.mxu0 %v994_v32  ;;  %1217 = vmatprep.mubr.bf16.mxu1 %v996_v33 }
 0x115   : > { %1178 = vmatmul.mubr.bf16.vlgmr.msra.gmra.mxu0 %v993_v36  ;;  %1218 = vmatmul.mubr.bf16.vlgmr.msra.gmra.mxu1 %v995_v28 }
 0x116   : > { %1240 = vmatpush1.bf16.xpose.msra.mxu0 %v1608_v34  ;;  %1280 = vmatpush1.bf16.xpose.msra.mxu1 %v1610_v35 }
 0x117   : > { %v845_v38 = vpop.f32.mrf.mxu0  ;;  %v886_v39 = vpop.f32.mrf.mxu1  ;;  %1638 = vmatprep.subr.bf16.mxu1 %v1779_v31  ;;  %1319 = vmatprep.subr.bf16.mxu0 %v1613_v37 }
 0x118   : > { %v846_v40 = vadd.f32 %v845_v38, %v2041_v50  ;;  %v887_v41 = vadd.f32 %v886_v39, %v2041_v50 }
 0x119   : > { %v847_v42 = vpop.f32.mrf.mxu0  ;;  %v888_v43 = vpop.f32.mrf.mxu1 }
 0x11a   : > { %v848_v44 = vadd.f32 %v847_v42, %v2041_v50  ;;  %v889_v45 = vadd.f32 %v888_v43, %v2041_v50  ;;  %v982_v46 = vmax.f32 %v846_v40, 0.0  ;;  %v984_v47 = vmax.f32 %v887_v41, 0.0 }
 0x11b   : > { %v849_v48 = vpop.f32.mrf.mxu0  ;;  %v890_v49 = vpop.f32.mrf.mxu1 }
 0x11c   : > { %v983_v51 = vmax.f32 %v848_v44, 0.0  ;;  %v985_v52 = vmax.f32 %v889_v45, 0.0  ;;  %v997_v59 = vpack.c.bf16 %v982_v46, %v982_v46  ;;  %v999_v60 = vpack.c.bf16 %v984_v47, %v984_v47 }
 0x11d   : > { %v850_v53 = vpop.f32.mrf.mxu0  ;;  %v891_v54 = vpop.f32.mrf.mxu1 }
 0x11e   : > { %v998_v55 = vpack.c.bf16 %v983_v51, %v983_v51  ;;  %v1000_v56 = vpack.c.bf16 %v985_v52, %v985_v52 }
 0x120   : > { %1257 = vmatprep.mubr.bf16.mxu0 %v998_v55  ;;  %1297 = vmatprep.mubr.bf16.mxu1 %v1000_v56 }
 0x121   : > { %1258 = vmatmul.mubr.bf16.vlgmr.msra.gmra.mxu0 %v997_v59  ;;  %1298 = vmatmul.mubr.bf16.vlgmr.msra.gmra.mxu1 %v999_v60 }
 0x122   : > { %1639 = vmatpush3.bf16.xpose.msra.mxu1 %v1751_v57  ;;  %1320 = vmatpush1.bf16.xpose.msra.mxu0 %v1612_v58  ;;  %v1615_v58 = vld [vmem:[%s2103_s4] ss:$0 sm:$0xff] }
 0x123   : > { %v927_v61 = vpop.f32.mrf.mxu0  ;;  %v968_v62 = vpop.f32.mrf.mxu1  ;;  %1640 = vmatprep.mubr.msk.bf16.mxu1 %vm1780_vm2, %v1779_v31  ;;  %1644 = vmatprep.subr.bf16.mxu0 %v1779_v31 }
 0x124   : > { %v928_v63 = vadd.f32 %v927_v61, %v2041_v50  ;;  %v969_v0 = vadd.f32 %v968_v62, %v2041_v50 }
 0x125   : > { %v929_v1 = vpop.f32.mrf.mxu0  ;;  %v1636_v2 = vpop.f32.mrf.mxu1 }
 0x126   : > { %v988_v3 = vmax.f32 %v969_v0, 0.0  ;;  %v930_v4 = vadd.f32 %v929_v1, %v2041_v50  ;;  %v986_v5 = vmax.f32 %v928_v63, 0.0  ;;  %v1417_v50 = vsel %vm1415_vm3, %v1387_v14, 0 }
 0x127   : > { %v931_v6 = vpop.f32.mrf.mxu0  ;;  %v971_v7 = vpop.f32.mrf.mxu1 }
 0x128   : > { %v1003_v8 = vpack.c.bf16 %v988_v3, %v988_v3  ;;  %v987_v9 = vmax.f32 %v930_v4, 0.0  ;;  %v1001_v13 = vpack.c.bf16 %v986_v5, %v986_v5 }
 0x129   : > { %v932_v10 = vpop.f32.mrf.mxu0  ;;  %v1637_v11 = vpop.f32.mrf.mxu1 }
 0x12a   : > { %v1002_v12 = vpack.c.bf16 %v987_v9, %v987_v9  ;;  %1641 = vmatmul.mubr.bf16.vlgmr.msra.gmra.mxu1 %v1003_v8 }
 0x12c   : > { %1337 = vmatprep.mubr.bf16.mxu0 %v1002_v12 }
 0x12d   : > { %1338 = vmatmul.mubr.bf16.vlgmr.msra.gmra.mxu0 %v1001_v13 }
 0x12e   : > { %1646 = vmatprep.mubr.msk.bf16.mxu0 %vm1780_vm2, %v1779_v31  ;;  %1645 = vmatpush3.bf16.msra.mxu0 %v1417_v50 }
 0x1c9   : > { %v1099_v15 = vpop.f32.mrf.mxu0  ;;  %v1139_v16 = vpop.f32.mrf.mxu1 }
 0x1ca   : > { %v1140_v30 = vadd.f32 %v1139_v16, %v1099_v15 }
 0x1cb   : > { %v1101_v17 = vpop.f32.mrf.mxu0  ;;  %v1141_v18 = vpop.f32.mrf.mxu1 }
 0x1cd   : > { %v1102_v19 = vpop.f32.mrf.mxu0  ;;  %v1142_v20 = vpop.f32.mrf.mxu1 }
 0x1cf   : > { %v1103_v21 = vpop.f32.mrf.mxu0  ;;  %v1143_v22 = vpop.f32.mrf.mxu1 }
 0x1d5   : > { %v1179_v23 = vpop.f32.mrf.mxu0  ;;  %v1219_v24 = vpop.f32.mrf.mxu1 }
 0x1d6   : > { %v1180_v34 = vadd.f32 %v1179_v23, %v1140_v30 }
 0x1d7   : > { %v1181_v25 = vpop.f32.mrf.mxu0  ;;  %v1221_v26 = vpop.f32.mrf.mxu1 }
 0x1d8   : > { %v1220_v39 = vadd.f32 %v1219_v24, %v1180_v34 }
 0x1d9   : > { %v1182_v31 = vpop.f32.mrf.mxu0  ;;  %v1222_v27 = vpop.f32.mrf.mxu1 }
 0x1db   : > { %v1183_v28 = vpop.f32.mrf.mxu0  ;;  %v1223_v29 = vpop.f32.mrf.mxu1 }
 0x1e1   : > { %v1259_v32 = vpop.f32.mrf.mxu0  ;;  %v1299_v33 = vpop.f32.mrf.mxu1 }
 0x1e2   : > { %v1260_v42 = vadd.f32 %v1259_v32, %v1220_v39 }
 0x1e3   : > { %v1261_v35 = vpop.f32.mrf.mxu0  ;;  %v1301_v36 = vpop.f32.mrf.mxu1 }
 0x1e4   : > { %v1300_v44 = vadd.f32 %v1299_v33, %v1260_v42 }
 0x1e5   : > { %v1262_v37 = vpop.f32.mrf.mxu0  ;;  %v1302_v38 = vpop.f32.mrf.mxu1 }
 0x1e7   : > { %v1263_v40 = vpop.f32.mrf.mxu0  ;;  %v1303_v41 = vpop.f32.mrf.mxu1 }
 0x1ea   : > { %v1379_v43 = vpop.f32.mrf.mxu1 }
 0x1ec   : > { %v1642_v45 = vpop.f32.mrf.mxu1 }
 0x1ed   : > { %v1339_v46 = vpop.f32.mrf.mxu0 }
 0x1ee   : > { %v1340_v47 = vadd.f32 %v1339_v46, %v1300_v44  ;;  %v1382_v48 = vpop.f32.mrf.mxu1 }
 0x1ef   : > { %v1341_v49 = vpop.f32.mrf.mxu0 }
 0x1f0   : > { %v1380_v51 = vadd.f32 %v1379_v43, %v1340_v47  ;;  %v1643_v52 = vpop.f32.mrf.mxu1 }
 0x1f1   : > { %v1342_v53 = vpop.f32.mrf.mxu0 }
 0x1f2   : > { %v1385_v54 = vmul.f32 0.00390625, %v1380_v51 }
 0x1f3   : > { %v1343_v55 = vpop.f32.mrf.mxu0 }
 0x1f4   : > { %v1386_v56 = vpack.c.bf16 %v1385_v54, %v1385_v54 }
 0x1f6   : > { %1395 = vxpose.xlu0.c.b16.start.end [1/1] (short) (narrow) %v1386_v56, 16 }
 0x258   : > { %v1403_v57 = vpop.trf.xlu0 }
 0x259   : > { %1647 = vmatmul.mubr.msk.bf16.vlgmr.msra.gmra.mxu0 %vm1411_vm4, %v1403_v57 }
 0x319   : > { %v1453_v59 = vpop.f32.mrf.mxu0 }
 0x31a   : > { %v1454_v60 = vadd.f32 %v1615_v58, %v1453_v59 }
 0x31b   : > { %v1648_v61 = vpop.f32.mrf.mxu0 }
 0x31c   : > { %1459 = vst [vmem:[%s358_s27] sm:$0x1f] %v1454_v60 }
 0x31d   : > { %v1456_v62 = vpop.f32.mrf.mxu0 }
 0x31f   : > { %v1649_v63 = vpop.f32.mrf.mxu0 }
 0x320 PF: > { %p13_p9 = scmp.ge.s32.totalorder %s1833_s25, 6   ;;  %s2106_s21 = smov %s1772_s22 }
 0x321   : > { %s2107_s22 = smov %s1842_s28  ;;  %s2108_s23 = smov %s1833_s25 }
 0x322   :  { %15 = sbr.rel (!%p13_p9) target bundleno = 2 (0x2), region = 111 }

</bundles_post_ra>
